<compile_context>
chip_gen: v7x
topology: tpu7x:2x2x1
jax: 0.10.0
libtpu: 0.0.40
codegen_flags: <defaults>
</compile_context>

<pallas_src>
import jax
import jax.numpy as jnp
from jax.experimental import pallas as pl
from jax.experimental.pallas import tpu as pltpu


def model_kernel(p_ref, o_ref):
    # p_ref: SMEM (7,) f32 = [x00, x01, x10, x11, w0, w1, b]
    # o_ref: SMEM (1,) f32
    x00 = p_ref[0]
    x01 = p_ref[1]
    x10 = p_ref[2]
    x11 = p_ref[3]
    w0 = p_ref[4]
    w1 = p_ref[5]
    b = p_ref[6]

    # Linear(2 -> 1) on the two rows the forward actually uses (scalar FMAs).
    v1_0 = x00 * w0 + x01 * w1 + b
    v1_1 = x10 * w0 + x11 * w1 + b

    v4 = jnp.maximum(v1_0 - 4.0, v1_1 - 4.0)
    o_ref[0] = v1_0 * v1_1 * v4


@jax.jit
def model_forward(x, weight, bias):
    # x: (N, 2) with N >= 2; weight: (1, 2) (PyTorch Linear layout); bias: (1,)
    assert x.shape[0] >= 2, "forward indexes v1[0] and v1[1]; need batch >= 2"
    x2 = x[:2, :].astype(jnp.float32).reshape(4)     # rows 2..N-1 are dead work
    w = weight.reshape(2).astype(jnp.float32)
    b = bias.reshape(1).astype(jnp.float32)
    params = jnp.concatenate([x2, w, b])             # (7,) single SMEM operand

    out = pl.pallas_call(
        model_kernel,
        out_shape=jax.ShapeDtypeStruct((1,), jnp.float32),
        in_specs=[
            pl.BlockSpec(memory_space=pltpu.MemorySpace.SMEM),   # params (7,)
        ],
        out_specs=pl.BlockSpec(memory_space=pltpu.MemorySpace.SMEM),
        cost_estimate=pl.CostEstimate(flops=12, bytes_accessed=40,
                                      transcendentals=0),
    )(params)
    return out                                        # matches PyTorch output (1,)


def model_forward_ref(x, weight, bias):
    v1 = x.astype(jnp.float32) @ weight.astype(jnp.float32).T + bias
    v2 = v1[0] - 4.0
    v3 = v1[1] - 4.0
    v4 = jnp.maximum(v2, v3)
    return v1[0] * v1[1] * v4


if __name__ == "__main__":
    key = jax.random.PRNGKey(0)
    kx, kw, kb = jax.random.split(key, 3)

    # Small shapes consistent with the module: batch=8 rows of 2 features.
    x = jax.random.normal(kx, (8, 2), dtype=jnp.float32)
    # Deterministic parameter init (Linear(2, 1): weight (1, 2), bias (1,)).
    weight = jax.random.uniform(kw, (1, 2), dtype=jnp.float32, minval=-0.7, maxval=0.7)
    bias = jax.random.uniform(kb, (1,), dtype=jnp.float32, minval=-0.7, maxval=0.7)

    out = jax.block_until_ready(model_forward(x, weight, bias))
    ref = jax.block_until_ready(model_forward_ref(x, weight, bias))

    assert out.shape == (1,), out.shape
    assert jnp.allclose(out, ref, atol=1e-5, rtol=1e-5), (out, ref)
    print("KERNEL_OK")
</pallas_src>

<mosaic_0001>
module attributes {stable_mosaic.version = 11 : i64} {
  func.func @model_kernel(%arg0: memref<7xf32, #tpu.memory_space<smem>>, %arg1: memref<1xf32, #tpu.memory_space<smem>>) attributes {dimension_semantics = [], scalar_prefetch = 0 : i64, scratch_operands = 0 : i64, tpu.core_type = #tpu.core_type<tc>} {
    %c0 = arith.constant 0 : index
    %0 = memref.load %arg0[%c0] : memref<7xf32, #tpu.memory_space<smem>>
    %c1 = arith.constant 1 : index
    %1 = memref.load %arg0[%c1] : memref<7xf32, #tpu.memory_space<smem>>
    %c2 = arith.constant 2 : index
    %2 = memref.load %arg0[%c2] : memref<7xf32, #tpu.memory_space<smem>>
    %c3 = arith.constant 3 : index
    %3 = memref.load %arg0[%c3] : memref<7xf32, #tpu.memory_space<smem>>
    %c4 = arith.constant 4 : index
    %4 = memref.load %arg0[%c4] : memref<7xf32, #tpu.memory_space<smem>>
    %c5 = arith.constant 5 : index
    %5 = memref.load %arg0[%c5] : memref<7xf32, #tpu.memory_space<smem>>
    %c6 = arith.constant 6 : index
    %6 = memref.load %arg0[%c6] : memref<7xf32, #tpu.memory_space<smem>>
    %7 = arith.mulf %0, %4 : f32
    %8 = arith.mulf %1, %5 : f32
    %9 = arith.addf %7, %8 : f32
    %10 = arith.addf %9, %6 : f32
    %11 = arith.mulf %2, %4 : f32
    %12 = arith.mulf %3, %5 : f32
    %13 = arith.addf %11, %12 : f32
    %14 = arith.addf %13, %6 : f32
    %cst = arith.constant 4.000000e+00 : f32
    %15 = arith.subf %10, %cst : f32
    %cst_0 = arith.constant 4.000000e+00 : f32
    %16 = arith.subf %14, %cst_0 : f32
    %17 = arith.maximumf %15, %16 : f32
    %18 = arith.mulf %10, %14 : f32
    %19 = arith.mulf %18, %17 : f32
    %c0_1 = arith.constant 0 : index
    %20 = memref.load %arg1[%c0_1] : memref<1xf32, #tpu.memory_space<smem>>
    memref.store %19, %arg1[%c0_1] : memref<1xf32, #tpu.memory_space<smem>>
    return
  }
}

</mosaic_0001>

<bundles_post_ra>
// kernel: model_forward.1
= control target key start
LH: loop header
LB: loop body
LE: loop exit
PB: predicated region body
PF: predicated region fallthrough
CT: control target
= control target key end

     0   :  { %6 = vsyncpa [#allocation4], 0  ;;  %s121_s0 = inlined_call_operand.vmem [shape: f32[7], index: 0, kind: input, shape index: {}]   ;;  %s122_s1 = inlined_call_operand.hbm [shape: f32[1], index: 1, kind: output, shape index: {}]  }
   0x1   :  { %7 = vsyncpa [#allocation3], 0  ;;  %s14_s8 = sshll.u32 %s121_s0, 4  ;;  %s15_s8 = int_to_ptr.vmem [resolvable:$true] %s14_s8 }
   0x2   :  { %s68_s9 = scalar_lea.vmem %s15_s8, 16  ;;  %p73_p1 = scmp.lt.s32.totalorder %s15_s8, %s15_s8 }
   0x3   :  { %p69_p0 = scmp.ne.s32.totalorder %s15_s8, %s68_s9  ;;  %p74_p2 = scmp.lt.s32.totalorder %s68_s9, %s68_s9 }
   0x5   :  { %p75_p3 = por %p74_p2, %p73_p1 }
   0x7   :  { %p76_p4 = pnand %p75_p3, %p69_p0 }
   0x9   :  { %79 = shalt.err (!%p76_p4)
}
   0xa   :  { %s94_s10 = smov [#allocation2]  }
   0xb   :  { %17 = dma.vmem_to_smem %s15_s8, 16, %s94_s10, [#allocation4]  }
   0xc   :  { %90 = dma.done.wait [#allocation4], 16  }
   0xd   :  { %91 = vsyncadd [#allocation4], 4294967280 }
   0xe   :  { %21 = sfence }
   0xf   :  { %s22_s11 = sld [smem:[#allocation2]]  ;;  %s58_s12 = sld [smem:[#allocation2 + $0x1]] }
  0x10   :  { %s59_s13 = sld [smem:[#allocation2 + $0x2]]  ;;  %s61_s14 = sld [smem:[#allocation2 + $0x4]] }
  0x11   :  { %s62_s15 = sld [smem:[#allocation2 + $0x5]]  ;;  %s60_s16 = sld [smem:[#allocation2 + $0x3]] }
  0x12   :  { %s63_s0 = sld [smem:[#allocation2 + $0x6]]  ;;  %s80_s3 = scalar_lea.hbm %s122_s1, 16 }
  0x13   :  { %p81_p5 = scmp.ne.s32.totalorder %s122_s1, %s80_s3  ;;  %p84_p6 = scmp.lt.u32.totalorder %s80_s3, %s122_s1 }
  0x15   :  { %p86_p7 = pnand %p84_p6, %p81_p5 }
  0x16   :  { %s29_s17 = smul.f32 %s61_s14, %s22_s11 }
  0x17   :  { %s30_s18 = smul.f32 %s62_s15, %s58_s12 }
  0x18   :  { %s33_s19 = smul.f32 %s61_s14, %s59_s13 }
  0x19   :  { %s31_s20 = sadd.f32 %s30_s18, %s29_s17  ;;  %s34_s21 = smul.f32 %s62_s15, %s60_s16 }
  0x1b   :  { %s32_s22 = sadd.f32 %s63_s0, %s31_s20 }
  0x1c   :  { %s35_s23 = sadd.f32 %s34_s21, %s33_s19 }
  0x1d   :  { %s64_s24 = sadd.f32 -4.0, %s32_s22 }
  0x1e   :  { %s36_s25 = sadd.f32 %s63_s0, %s35_s23 }
  0x20   :  { %s65_s26 = sadd.f32 -4.0, %s36_s25  ;;  %s40_s27 = smul.f32 %s36_s25, %s32_s22 }
  0x22   :  { %s39_s28 = smax.f32 %s65_s26, %s64_s24 }
  0x23   :  { %s41_s29 = smul.f32 %s40_s27, %s39_s28 }
  0x25   :  { %43 = sst [smem:[#allocation5]] %s41_s29 }
  0x26   :  { %89 = shalt.err (!%p86_p7)
}
  0x27   :  { %s95_s8 = smov [#allocation5]  }
  0x28   :  { %51 = dma.smem_to_hbm %s95_s8, 16, %s122_s1, [#allocation3]  }
  0x29   :  { %92 = dma.done.wait [#allocation3], 16  }
  0x2a   :  { %93 = vsyncadd [#allocation3], 4294967280 }
  0x2b   :  { %55 = sfence }
  0x2c   :  { %56 = vsyncpa [#allocation3], 1 }
  0x2d   :  { %57 = vsyncpa [#allocation4], 1 }

</bundles_post_ra>
